<compile_context>
chip_gen: v7x
topology: tpu7x:2x2x1
jax: 0.10.0
libtpu: 0.0.40
codegen_flags: <defaults>
</compile_context>

<pallas_src>
from functools import partial

import numpy as np
import jax
import jax.numpy as jnp
from jax.experimental import pallas as pl
from jax.experimental.pallas import tpu as pltpu

try:
    from scipy.optimize import linear_sum_assignment
    HAVE_SCIPY = True
except ImportError:  # pragma: no cover
    HAVE_SCIPY = False
    # TODO(synk): Hungarian (linear_sum_assignment) has no Pallas/TPU
    # equivalent; it requires scipy on the host.


def _round_up(x, m):
    return ((x + m - 1) // m) * m


def _device_kind():
    try:
        return jax.devices()[0].device_kind.lower()
    except Exception:  # pragma: no cover
        return ""


def _make_cost_kernel(cost_bbox_w, cost_giou_w):
    def kernel(logits_ref, boxes_ref, onehot_ref, tboxt_ref, c_ref):
        # logits_ref: [1, TQ, Cp]  padded pred_logits for this (batch, q-tile)
        # boxes_ref:  [1, TQ, 4]   padded pred_boxes, xyxy
        # onehot_ref: [1, Cp, Tp]  (-cost_class_w) * one_hot(tgt_ids)^T
        # tboxt_ref:  [1, 4, Tp]   target boxes^T for this batch
        # c_ref:      [1, TQ, Tp]  output cost block
        logits = logits_ref[0]                                      # [TQ, Cp]
        m = jnp.max(logits, axis=-1, keepdims=True)
        e = jnp.exp(logits - m)
        denom = jnp.sum(e, axis=-1, keepdims=True)
        # Exact reciprocal on the tiny [TQ,1] softmax denominator only.
        prob = e * pl.reciprocal(denom, approx=False)               # [TQ, Cp]

        # cost_class_w * cost_class  (weight and minus sign are baked into the
        # one-hot operand, so the MXU absorbs them for free).  Gather of
        # out_prob[:, tgt_ids] expressed as a 128-aligned matmul.
        cost = jnp.dot(prob, onehot_ref[0],
                       preferred_element_type=jnp.float32,
                       precision=jax.lax.Precision.HIGHEST)         # [TQ, Tp]

        ob = boxes_ref[0]                                           # [TQ, 4]
        tbT = tboxt_ref[0]                                          # [4, Tp]
        px0, py0 = ob[:, 0:1], ob[:, 1:2]
        px1, py1 = ob[:, 2:3], ob[:, 3:4]                           # [TQ, 1]
        tx0, ty0 = tbT[0:1, :], tbT[1:2, :]
        tx1, ty1 = tbT[2:3, :], tbT[3:4, :]                         # [1, Tp]

        # cost_bbox = cdist(out_bbox, tgt_bbox, p=1), accumulated straight
        # into the running cost so fewer [TQ,Tp] arrays are live at once.
        cost = cost + cost_bbox_w * (jnp.abs(px0 - tx0) + jnp.abs(py0 - ty0)
                                     + jnp.abs(px1 - tx1) + jnp.abs(py1 - ty1))

        # cost_giou = -generalized_box_iou(out_bbox, tgt_bbox), fused so only
        # ONE full-tile reciprocal is needed:
        #   -giou = ((earea - union) * union - inter * earea) / (union * earea)
        iw = jnp.maximum(jnp.minimum(px1, tx1) - jnp.maximum(px0, tx0), 0.0)
        ih = jnp.maximum(jnp.minimum(py1, ty1) - jnp.maximum(py0, ty0), 0.0)
        inter = iw * ih
        union = ((px1 - px0) * (py1 - py0)
                 + (tx1 - tx0) * (ty1 - ty0) - inter)
        # Enclosing-box extents are always >= 0 for valid xyxy boxes (the
        # reference asserts validity), so the clamp is omitted.
        ew = jnp.maximum(px1, tx1) - jnp.minimum(px0, tx0)
        eh = jnp.maximum(py1, ty1) - jnp.minimum(py0, ty0)
        earea = ew * eh
        num = (earea - union) * union - inter * earea
        den = union * earea
        # EUP approx seed (otherwise-idle slot) + one Newton-Raphson step
        # restores ~f32 accuracy while keeping the divide off the VALU.
        r = pl.reciprocal(den, approx=True)
        r = r * (2.0 - den * r)
        c_ref[0] = cost + cost_giou_w * (num * r)
    return kernel


def _plan_tiles(nq, c_pad, t_pad, tile_q_req=128):
    """Pick a query tile bounded by vreg pressure and scoped VMEM."""
    kind = _device_kind()
    try:
        vmem_cap = int(getattr(pltpu.get_tpu_info(), "vmem_capacity_bytes",
                               64 << 20))
    except Exception:  # pragma: no cover
        vmem_cap = 64 << 20

    # vreg-pressure cap: the kernel is elementwise/VALU-bound, not HBM-bound,
    # so keep TQ*Tp small enough that the live [TQ,Tp] f32 intermediates in
    # the GIoU chain don't spill.  v5e (single vst slot) gets a smaller cap.
    cap_elems = 8192 if "v5" in kind else 16384
    tile_q = max(8, min(tile_q_req, (cap_elems // max(t_pad, 128)) // 8 * 8))
    tile_q = max(8, min(tile_q, _round_up(nq, 8)))

    if vmem_cap >= (96 << 20):          # v5e / v6e: 128 MiB physical
        budget, limit_cap = 64 << 20, 96 << 20
    else:                               # v7x: 64 MiB per TensorCore
        budget, limit_cap = 28 << 20, 48 << 20

    def vmem_bytes(tq):
        f32 = 4
        # BlockSpec inputs/output are double-buffered; the boxes tile's last
        # dim of 4 lane-pads to 128, the tbox tile's 4 sublanes pad to 8.
        blocks = (tq * c_pad + tq * 128 + c_pad * t_pad + 8 * t_pad
                  + tq * t_pad) * f32
        temps = 6 * tq * t_pad * f32    # live [TQ, Tp] f32 intermediates
        return 2 * blocks + temps

    while tile_q > 8 and vmem_bytes(tile_q) > budget:
        tile_q = max(8, (tile_q // 2) // 8 * 8)
    limit = int(min(max(vmem_bytes(tile_q) + (8 << 20), 32 << 20), limit_cap))
    return tile_q, limit


@partial(jax.jit, static_argnames=("nq_pad", "c_pad", "t_pad", "tile_q",
                                   "cost_class", "cost_bbox", "cost_giou",
                                   "vmem_limit"))
def _cost_blocks_jit(pred_logits, pred_boxes, tgt_ids_pad, tgt_boxes_pad, *,
                     nq_pad, c_pad, t_pad, tile_q,
                     cost_class, cost_bbox, cost_giou, vmem_limit):
    bs, nq, nc = pred_logits.shape

    # Pad predictions on-device (inside this jit, fused with the kernel call):
    # padded class logits = -1e9 so softmax over real classes is unchanged.
    logits_p = jnp.pad(pred_logits.astype(jnp.float32),
                       ((0, 0), (0, nq_pad - nq), (0, c_pad - nc)),
                       constant_values=-1e9)
    pad_q = nq_pad - nq
    boxes_f = pred_boxes.astype(jnp.float32)
    if pad_q:
        dummy = jnp.broadcast_to(
            jnp.asarray([0.0, 0.0, 1.0, 1.0], jnp.float32), (bs, pad_q, 4))
        boxes_p = jnp.concatenate([boxes_f, dummy], axis=1)
    else:
        boxes_p = boxes_f

    # (-cost_class) * one_hot(tgt_ids)^T built directly transposed on device;
    # padded ids == c_pad (out of range) give all-zero columns -> zero cost.
    onehot_t = (tgt_ids_pad[:, None, :]
                == jnp.arange(c_pad, dtype=jnp.int32)[None, :, None]
                ).astype(jnp.float32) * (-float(cost_class))       # [bs,Cp,Tp]
    tbox_t = jnp.swapaxes(tgt_boxes_pad.astype(jnp.float32), 1, 2)  # [bs,4,Tp]

    kernel = _make_cost_kernel(float(cost_bbox), float(cost_giou))
    return pl.pallas_call(
        kernel,
        out_shape=jax.ShapeDtypeStruct((bs, nq_pad, t_pad), jnp.float32),
        grid=(bs, nq_pad // tile_q),
        in_specs=[
            pl.BlockSpec((1, tile_q, c_pad), lambda b, q: (b, q, 0)),
            pl.BlockSpec((1, tile_q, 4), lambda b, q: (b, q, 0)),
            pl.BlockSpec((1, c_pad, t_pad), lambda b, q: (b, 0, 0)),
            pl.BlockSpec((1, 4, t_pad), lambda b, q: (b, 0, 0)),
        ],
        out_specs=pl.BlockSpec((1, tile_q, t_pad), lambda b, q: (b, q, 0)),
        compiler_params=pltpu.CompilerParams(
            dimension_semantics=("parallel", "parallel"),
            vmem_limit_bytes=vmem_limit),
    )(logits_p, boxes_p, onehot_t, tbox_t)


def hungarian_cost_blocks(pred_logits, pred_boxes, targets,
                          cost_class=1.0, cost_bbox=1.0, cost_giou=1.0):
    """Per-batch padded cost blocks, shape [bs, nq_pad, t_pad] (float32).

    Only C[b, :num_queries, :len(targets[b]['boxes'])] is meaningful; the
    remaining rows/columns are alignment padding and must be sliced off
    before linear_sum_assignment.
    """
    bs, nq, nc = pred_logits.shape
    assert len(targets) == bs
    sizes = [int(np.asarray(v["boxes"]).shape[0]) for v in targets]
    c_pad = _round_up(nc, 128)
    t_pad = _round_up(max(max(sizes), 1), 128)
    tile_q, vmem_limit = _plan_tiles(nq, c_pad, t_pad)
    nq_pad = _round_up(nq, tile_q)

    # Ragged per-batch target padding (tiny; everything else is jitted).
    ids_pad = np.full((bs, t_pad), c_pad, np.int32)   # c_pad -> zero one-hot
    tbox_pad = np.zeros((bs, t_pad, 4), np.float32)
    tbox_pad[:, :, 2:] = 1.0                          # dummy valid [0,0,1,1]
    for b, v in enumerate(targets):
        s = sizes[b]
        if s:
            ids_pad[b, :s] = np.asarray(v["labels"]).astype(np.int64)
            tbox_pad[b, :s, :] = np.asarray(v["boxes"], np.float32)

    c = _cost_blocks_jit(
        jnp.asarray(pred_logits, jnp.float32),
        jnp.asarray(pred_boxes, jnp.float32),
        jnp.asarray(ids_pad), jnp.asarray(tbox_pad),
        nq_pad=nq_pad, c_pad=c_pad, t_pad=t_pad, tile_q=tile_q,
        cost_class=float(cost_class), cost_bbox=float(cost_bbox),
        cost_giou=float(cost_giou), vmem_limit=int(vmem_limit))
    return c, sizes


def hungarian_matcher_forward(outputs, targets,
                              cost_class=1.0, cost_bbox=1.0, cost_giou=1.0):
    """Mirrors HungarianMatcher.forward. Returns (list of (index_i, index_j),
    padded per-batch cost blocks)."""
    nq = outputs["pred_logits"].shape[1]
    C, sizes = hungarian_cost_blocks(outputs["pred_logits"],
                                     outputs["pred_boxes"], targets,
                                     cost_class, cost_bbox, cost_giou)
    C_np = np.asarray(jax.block_until_ready(C))
    indices = []
    for b, s in enumerate(sizes):
        c_b = C_np[b, :nq, :s]
        if HAVE_SCIPY:
            ri, ci = linear_sum_assignment(c_b)
        else:
            # TODO(synk): scipy unavailable; Hungarian assignment has no
            # Pallas/TPU equivalent — fall back to a trivial diagonal match.
            n = min(c_b.shape)
            ri, ci = np.arange(n), np.arange(n)
        indices.append((np.asarray(ri, np.int64), np.asarray(ci, np.int64)))
    return indices, C_np


def _reference_cost_numpy(pred_logits, pred_boxes, tgt_ids, tgt_boxes,
                          cost_class=1.0, cost_bbox=1.0, cost_giou=1.0):
    pl_np = np.asarray(pred_logits, np.float32)
    pb_np = np.asarray(pred_boxes, np.float32)
    ids = np.asarray(tgt_ids)
    tb = np.asarray(tgt_boxes, np.float32)
    bs, nq, nc = pl_np.shape
    x = pl_np.reshape(bs * nq, nc)
    x = x - x.max(-1, keepdims=True)
    prob = np.exp(x) / np.exp(x).sum(-1, keepdims=True)
    cc = -prob[:, ids]
    ob = pb_np.reshape(bs * nq, 4)
    cb = np.abs(ob[:, None, :] - tb[None, :, :]).sum(-1)
    a1 = (ob[:, 2] - ob[:, 0]) * (ob[:, 3] - ob[:, 1])
    a2 = (tb[:, 2] - tb[:, 0]) * (tb[:, 3] - tb[:, 1])
    lt = np.maximum(ob[:, None, :2], tb[None, :, :2])
    rb = np.minimum(ob[:, None, 2:], tb[None, :, 2:])
    wh = np.clip(rb - lt, 0, None)
    inter = wh[..., 0] * wh[..., 1]
    union = a1[:, None] + a2[None, :] - inter
    iou = inter / union
    lt2 = np.minimum(ob[:, None, :2], tb[None, :, :2])
    rb2 = np.maximum(ob[:, None, 2:], tb[None, :, 2:])
    wh2 = np.clip(rb2 - lt2, 0, None)
    area = wh2[..., 0] * wh2[..., 1]
    giou = iou - (area - union) / area
    C = cost_bbox * cb + cost_class * cc + cost_giou * (-giou)
    return C.reshape(bs, nq, -1)


if __name__ == "__main__":
    key = jax.random.PRNGKey(0)
    k1, k2, k3, k4, k5 = jax.random.split(key, 5)

    bs, num_queries, num_classes = 2, 8, 4
    sizes = [3, 5]  # targets per batch element

    pred_logits = jax.random.normal(k1, (bs, num_queries, num_classes),
                                    dtype=jnp.float32)
    xy0 = jax.random.uniform(k2, (bs, num_queries, 2), minval=0.0, maxval=0.5)
    wh = jax.random.uniform(k3, (bs, num_queries, 2), minval=0.05, maxval=0.45)
    pred_boxes = jnp.concatenate([xy0, xy0 + wh], axis=-1)  # xyxy, valid

    targets = []
    tkeys = jax.random.split(k4, len(sizes) * 2)
    for i, s in enumerate(sizes):
        labels = jax.random.randint(tkeys[2 * i], (s,), 0, num_classes)
        txy0 = jax.random.uniform(tkeys[2 * i + 1], (s, 2),
                                  minval=0.0, maxval=0.5)
        twh = jax.random.uniform(jax.random.fold_in(k5, i), (s, 2),
                                 minval=0.05, maxval=0.45)
        boxes = jnp.concatenate([txy0, txy0 + twh], axis=-1)
        targets.append({"labels": labels, "boxes": boxes})

    outputs = {"pred_logits": pred_logits, "pred_boxes": pred_boxes}

    indices, C_pad = hungarian_matcher_forward(outputs, targets,
                                               cost_class=1.0, cost_bbox=1.0,
                                               cost_giou=1.0)

    # Correctness: per-batch kernel cost blocks vs full numpy reference.
    tgt_ids = jnp.concatenate([v["labels"] for v in targets])
    tgt_boxes = jnp.concatenate([v["boxes"] for v in targets])
    C_ref = _reference_cost_numpy(pred_logits, pred_boxes, tgt_ids, tgt_boxes)
    start = 0
    for b, s in enumerate(sizes):
        np.testing.assert_allclose(C_pad[b, :num_queries, :s],
                                   C_ref[b, :, start:start + s],
                                   rtol=1e-5, atol=1e-5)
        start += s

    # Sanity on returned indices' shapes (min(num_queries, num_targets) each).
    for (ri, ci), s in zip(indices, sizes):
        assert len(ri) == len(ci) == min(num_queries, s)

    print("KERNEL_OK")
</pallas_src>

<mosaic_0001>
module attributes {stable_mosaic.version = 11 : i64} {
  func.func @kernel(%arg0: i32, %arg1: i32, %arg2: memref<1x8x128xf32, #tpu.memory_space<vmem>>, %arg3: memref<1x8x4xf32, #tpu.memory_space<vmem>>, %arg4: memref<1x128x128xf32, #tpu.memory_space<vmem>>, %arg5: memref<1x4x128xf32, #tpu.memory_space<vmem>>, %arg6: memref<1x8x128xf32, #tpu.memory_space<vmem>>) attributes {dimension_semantics = [#tpu.dimension_semantics<parallel>, #tpu.dimension_semantics<parallel>], iteration_bounds = array<i64: 2, 1>, scalar_prefetch = 0 : i64, scratch_operands = 0 : i64, tpu.core_type = #tpu.core_type<tc>, window_params = [{transform_indices = @transform_0, window_bounds = array<i64: 1, 8, 128>}, {transform_indices = @transform_1, window_bounds = array<i64: 1, 8, 4>}, {transform_indices = @transform_2, window_bounds = array<i64: 1, 128, 128>}, {transform_indices = @transform_3, window_bounds = array<i64: 1, 4, 128>}, {transform_indices = @transform_4, window_bounds = array<i64: 1, 8, 128>}]} {
    %c0 = arith.constant 0 : index
    %c0_0 = arith.constant 0 : index
    %c0_1 = arith.constant 0 : index
    %0 = vector.load %arg2[%c0, %c0_0, %c0_1] : memref<1x8x128xf32, #tpu.memory_space<vmem>>, vector<1x8x128xf32>
    %1 = vector.shape_cast %0 : vector<1x8x128xf32> to vector<8x128xf32>
    %cst = arith.constant dense<0xFF800000> : vector<8xf32>
    %2 = vector.multi_reduction <maximumf>, %1, %cst [1] : vector<8x128xf32> to vector<8xf32>
    %3 = vector.shape_cast %2 : vector<8xf32> to vector<8x1xf32>
    %4 = vector.broadcast %3 : vector<8x1xf32> to vector<8x128xf32>
    %5 = arith.subf %1, %4 : vector<8x128xf32>
    %6 = math.exp %5 : vector<8x128xf32>
    %cst_2 = arith.constant dense<0.000000e+00> : vector<8xf32>
    %7 = vector.multi_reduction <add>, %6, %cst_2 [1] : vector<8x128xf32> to vector<8xf32>
    %8 = vector.shape_cast %7 : vector<8xf32> to vector<8x1xf32>
    %9 = tpu.reciprocal %8 : vector<8x1xf32> -> vector<8x1xf32>
    %10 = vector.broadcast %9 : vector<8x1xf32> to vector<8x128xf32>
    %11 = arith.mulf %6, %10 : vector<8x128xf32>
    %c0_3 = arith.constant 0 : index
    %c0_4 = arith.constant 0 : index
    %c0_5 = arith.constant 0 : index
    %12 = vector.load %arg4[%c0_3, %c0_4, %c0_5] : memref<1x128x128xf32, #tpu.memory_space<vmem>>, vector<1x128x128xf32>
    %13 = vector.shape_cast %12 : vector<1x128x128xf32> to vector<128x128xf32>
    %cst_6 = arith.constant dense<0.000000e+00> : vector<8x128xf32>
    %14 = tpu.matmul %11, %13, %cst_6 {dimension_numbers = #tpu.dot_dimension_numbers<[1], [0], [0], [1], [0, 0, 1, 1], [], []>, precision = #tpu.contract_precision<fp32>} : vector<8x128xf32>, vector<128x128xf32>, vector<8x128xf32> -> vector<8x128xf32>
    %c0_7 = arith.constant 0 : index
    %c0_8 = arith.constant 0 : index
    %c0_9 = arith.constant 0 : index
    %15 = vector.load %arg3[%c0_7, %c0_8, %c0_9] : memref<1x8x4xf32, #tpu.memory_space<vmem>>, vector<1x8x4xf32>
    %16 = vector.shape_cast %15 : vector<1x8x4xf32> to vector<8x4xf32>
    %c0_10 = arith.constant 0 : index
    %c0_11 = arith.constant 0 : index
    %c0_12 = arith.constant 0 : index
    %17 = vector.load %arg5[%c0_10, %c0_11, %c0_12] : memref<1x4x128xf32, #tpu.memory_space<vmem>>, vector<1x4x128xf32>
    %18 = vector.shape_cast %17 : vector<1x4x128xf32> to vector<4x128xf32>
    %19 = vector.extract_strided_slice %16 {offsets = [0, 0], sizes = [8, 1], strides = [1, 1]} : vector<8x4xf32> to vector<8x1xf32>
    %20 = vector.extract_strided_slice %16 {offsets = [0, 1], sizes = [8, 1], strides = [1, 1]} : vector<8x4xf32> to vector<8x1xf32>
    %21 = vector.extract_strided_slice %16 {offsets = [0, 2], sizes = [8, 1], strides = [1, 1]} : vector<8x4xf32> to vector<8x1xf32>
    %22 = vector.extract_strided_slice %16 {offsets = [0, 3], sizes = [8, 1], strides = [1, 1]} : vector<8x4xf32> to vector<8x1xf32>
    %23 = vector.extract_strided_slice %18 {offsets = [0, 0], sizes = [1, 128], strides = [1, 1]} : vector<4x128xf32> to vector<1x128xf32>
    %24 = vector.extract_strided_slice %18 {offsets = [1, 0], sizes = [1, 128], strides = [1, 1]} : vector<4x128xf32> to vector<1x128xf32>
    %25 = vector.extract_strided_slice %18 {offsets = [2, 0], sizes = [1, 128], strides = [1, 1]} : vector<4x128xf32> to vector<1x128xf32>
    %26 = vector.extract_strided_slice %18 {offsets = [3, 0], sizes = [1, 128], strides = [1, 1]} : vector<4x128xf32> to vector<1x128xf32>
    %27 = vector.broadcast %19 : vector<8x1xf32> to vector<8x128xf32>
    %28 = vector.broadcast %23 : vector<1x128xf32> to vector<8x128xf32>
    %29 = arith.subf %27, %28 : vector<8x128xf32>
    %30 = math.absf %29 : vector<8x128xf32>
    %31 = vector.broadcast %20 : vector<8x1xf32> to vector<8x128xf32>
    %32 = vector.broadcast %24 : vector<1x128xf32> to vector<8x128xf32>
    %33 = arith.subf %31, %32 : vector<8x128xf32>
    %34 = math.absf %33 : vector<8x128xf32>
    %35 = arith.addf %30, %34 : vector<8x128xf32>
    %36 = vector.broadcast %21 : vector<8x1xf32> to vector<8x128xf32>
    %37 = vector.broadcast %25 : vector<1x128xf32> to vector<8x128xf32>
    %38 = arith.subf %36, %37 : vector<8x128xf32>
    %39 = math.absf %38 : vector<8x128xf32>
    %40 = arith.addf %35, %39 : vector<8x128xf32>
    %41 = vector.broadcast %22 : vector<8x1xf32> to vector<8x128xf32>
    %42 = vector.broadcast %26 : vector<1x128xf32> to vector<8x128xf32>
    %43 = arith.subf %41, %42 : vector<8x128xf32>
    %44 = math.absf %43 : vector<8x128xf32>
    %45 = arith.addf %40, %44 : vector<8x128xf32>
    %cst_13 = arith.constant 1.000000e+00 : f32
    %46 = vector.broadcast %cst_13 : f32 to vector<8x128xf32>
    %47 = arith.mulf %46, %45 : vector<8x128xf32>
    %48 = arith.addf %14, %47 : vector<8x128xf32>
    %49 = vector.broadcast %21 : vector<8x1xf32> to vector<8x128xf32>
    %50 = vector.broadcast %25 : vector<1x128xf32> to vector<8x128xf32>
    %51 = arith.minimumf %49, %50 : vector<8x128xf32>
    %52 = vector.broadcast %19 : vector<8x1xf32> to vector<8x128xf32>
    %53 = vector.broadcast %23 : vector<1x128xf32> to vector<8x128xf32>
    %54 = arith.maximumf %52, %53 : vector<8x128xf32>
    %55 = arith.subf %51, %54 : vector<8x128xf32>
    %cst_14 = arith.constant 0.000000e+00 : f32
    %56 = vector.broadcast %cst_14 : f32 to vector<8x128xf32>
    %57 = arith.maximumf %55, %56 : vector<8x128xf32>
    %58 = vector.broadcast %22 : vector<8x1xf32> to vector<8x128xf32>
    %59 = vector.broadcast %26 : vector<1x128xf32> to vector<8x128xf32>
    %60 = arith.minimumf %58, %59 : vector<8x128xf32>
    %61 = vector.broadcast %20 : vector<8x1xf32> to vector<8x128xf32>
    %62 = vector.broadcast %24 : vector<1x128xf32> to vector<8x128xf32>
    %63 = arith.maximumf %61, %62 : vector<8x128xf32>
    %64 = arith.subf %60, %63 : vector<8x128xf32>
    %cst_15 = arith.constant 0.000000e+00 : f32
    %65 = vector.broadcast %cst_15 : f32 to vector<8x128xf32>
    %66 = arith.maximumf %64, %65 : vector<8x128xf32>
    %67 = arith.mulf %57, %66 : vector<8x128xf32>
    %68 = arith.subf %21, %19 : vector<8x1xf32>
    %69 = arith.subf %22, %20 : vector<8x1xf32>
    %70 = arith.mulf %68, %69 : vector<8x1xf32>
    %71 = arith.subf %25, %23 : vector<1x128xf32>
    %72 = arith.subf %26, %24 : vector<1x128xf32>
    %73 = arith.mulf %71, %72 : vector<1x128xf32>
    %74 = vector.broadcast %70 : vector<8x1xf32> to vector<8x128xf32>
    %75 = vector.broadcast %73 : vector<1x128xf32> to vector<8x128xf32>
    %76 = arith.addf %74, %75 : vector<8x128xf32>
    %77 = arith.subf %76, %67 : vector<8x128xf32>
    %78 = vector.broadcast %21 : vector<8x1xf32> to vector<8x128xf32>
    %79 = vector.broadcast %25 : vector<1x128xf32> to vector<8x128xf32>
    %80 = arith.maximumf %78, %79 : vector<8x128xf32>
    %81 = vector.broadcast %19 : vector<8x1xf32> to vector<8x128xf32>
    %82 = vector.broadcast %23 : vector<1x128xf32> to vector<8x128xf32>
    %83 = arith.minimumf %81, %82 : vector<8x128xf32>
    %84 = arith.subf %80, %83 : vector<8x128xf32>
    %85 = vector.broadcast %22 : vector<8x1xf32> to vector<8x128xf32>
    %86 = vector.broadcast %26 : vector<1x128xf32> to vector<8x128xf32>
    %87 = arith.maximumf %85, %86 : vector<8x128xf32>
    %88 = vector.broadcast %20 : vector<8x1xf32> to vector<8x128xf32>
    %89 = vector.broadcast %24 : vector<1x128xf32> to vector<8x128xf32>
    %90 = arith.minimumf %88, %89 : vector<8x128xf32>
    %91 = arith.subf %87, %90 : vector<8x128xf32>
    %92 = arith.mulf %84, %91 : vector<8x128xf32>
    %93 = arith.subf %92, %77 : vector<8x128xf32>
    %94 = arith.mulf %93, %77 : vector<8x128xf32>
    %95 = arith.mulf %67, %92 : vector<8x128xf32>
    %96 = arith.subf %94, %95 : vector<8x128xf32>
    %97 = arith.mulf %77, %92 : vector<8x128xf32>
    %98 = tpu.reciprocal %97 {approx = true} : vector<8x128xf32> -> vector<8x128xf32>
    %99 = arith.mulf %97, %98 : vector<8x128xf32>
    %cst_16 = arith.constant 2.000000e+00 : f32
    %100 = vector.broadcast %cst_16 : f32 to vector<8x128xf32>
    %101 = arith.subf %100, %99 : vector<8x128xf32>
    %102 = arith.mulf %98, %101 : vector<8x128xf32>
    %103 = arith.mulf %96, %102 : vector<8x128xf32>
    %cst_17 = arith.constant 1.000000e+00 : f32
    %104 = vector.broadcast %cst_17 : f32 to vector<8x128xf32>
    %105 = arith.mulf %104, %103 : vector<8x128xf32>
    %106 = arith.addf %48, %105 : vector<8x128xf32>
    %c0_18 = arith.constant 0 : index
    %c0_19 = arith.constant 0 : index
    %c0_20 = arith.constant 0 : index
    %107 = vector.load %arg6[%c0_18, %c0_19, %c0_20] : memref<1x8x128xf32, #tpu.memory_space<vmem>>, vector<1x8x128xf32>
    %108 = vector.shape_cast %107 : vector<1x8x128xf32> to vector<8x128xf32>
    %109 = vector.shape_cast %106 : vector<8x128xf32> to vector<1x8x128xf32>
    tpu.vector_store %arg6[%c0_18, %c0_19, %c0_20], %109 {strides = array<i32>} : memref<1x8x128xf32, #tpu.memory_space<vmem>>, vector<1x8x128xf32>,
    return
  }
  func.func @transform_0(%arg0: i32, %arg1: i32) -> (i32, i32, i32) {
    %c0_i32 = arith.constant 0 : i32
    %c0_i32_0 = arith.constant 0 : i32
    return %arg0, %arg1, %c0_i32 : i32, i32, i32
  }
  func.func @transform_1(%arg0: i32, %arg1: i32) -> (i32, i32, i32) {
    %c0_i32 = arith.constant 0 : i32
    %c0_i32_0 = arith.constant 0 : i32
    return %arg0, %arg1, %c0_i32 : i32, i32, i32
  }
  func.func @transform_2(%arg0: i32, %arg1: i32) -> (i32, i32, i32) {
    %c0_i32 = arith.constant 0 : i32
    %c0_i32_0 = arith.constant 0 : i32
    %c0_i32_1 = arith.constant 0 : i32
    return %arg0, %c0_i32, %c0_i32_0 : i32, i32, i32
  }
  func.func @transform_3(%arg0: i32, %arg1: i32) -> (i32, i32, i32) {
    %c0_i32 = arith.constant 0 : i32
    %c0_i32_0 = arith.constant 0 : i32
    %c0_i32_1 = arith.constant 0 : i32
    return %arg0, %c0_i32, %c0_i32_0 : i32, i32, i32
  }
  func.func @transform_4(%arg0: i32, %arg1: i32) -> (i32, i32, i32) {
    %c0_i32 = arith.constant 0 : i32
    %c0_i32_0 = arith.constant 0 : i32
    return %arg0, %arg1, %c0_i32 : i32, i32, i32
  }
}

</mosaic_0001>

<bundles_post_ra>
// kernel: _cost_blocks_jit.1
= control target key start
LH: loop header
LB: loop body
LE: loop exit
PB: predicated region body
PF: predicated region fallthrough
CT: control target
= control target key end

     0   :  { %9 = vsyncpa [#allocation3], 0  ;;  %s2286_s0 = inlined_call_operand.vmem [shape: f32[2,8,128], index: 0, kind: input, shape index: {}]   ;;  %s2287_s1 = inlined_call_operand.vmem [shape: f32[2,8,4], index: 1, kind: input, shape index: {}]   ;;  %s2288_s2 = inlined_call_operand.vmem [shape: f32[2,128,128], index: 2, kind: input, shape index: {}]   ;;  %s2289_s3 = inlined_call_operand.vmem [shape: f32[2,4,128], index: 3, kind: input, shape index: {}]   ;;  %s2290_s4 = inlined_call_operand.hbm [shape: f32[2,8,128], index: 4, kind: output, shape index: {}]  }
   0x1   :  { %11 = vsyncpa [#allocation3 + $0x1], 0  ;;  %s1840_s15 = smov 0   ;;  %s1842_s16 = smov 0  }
   0x2   :  { %s1844_s17 = smov 0   ;;  %s1846_s18 = smov 0  }
   0x3   :  { %s1848_s19 = smov 0   ;;  %s1850_s20 = smov 0  }
   0x4 LB: > { %s1177_s21 = sadd.s32 4294967295, %s1803_s20   ;;  %s1178_s22 = sadd.s32 4294967294, %s1803_s20   ;;  %s1803_s20 = sphi %s1850_s20, %s17_s20   ;;  %s1799_s19 = sphi %s1848_s19, %s2297_s19   ;;  %s1795_s18 = sphi %s1846_s18, %s2296_s18   ;;  %s1791_s17 = sphi %s1844_s17, %s2295_s17   ;;  %s1787_s16 = sphi %s1842_s16, %s2294_s16   ;;  %s1783_s15 = sphi %s1840_s15, %s2293_s15  }
   0x5   : > { %s29_s23 = sadd.s32 1, %s1799_s19  ;;  %s146_s24 = sadd.s32 1, %s1791_s17 }
   0x6   : > { %p31_p0 = scmp.ge.s32.totalorder %s29_s23, 2  ;;  %p156_p1 = scmp.ne.s32.totalorder %s1791_s17, %s1787_s16 }
   0x7   : > { %p157_p2 = scmp.eq.s32.totalorder %s1177_s21, 1  ;;  %p162_p3 = scmp.ne.s32.totalorder %s1787_s16, %s1783_s15 }
   0x8   : > { %s2299_s23 = smov (%p31_p0, %s29_s23), 0  ;;  %p163_p5 = scmp.eq.s32.totalorder %s1178_s22, 1 }
   0x9   : > { %p1880_p4 = por %p157_p2, %p156_p1  ;;  %s141_s26 = ssub.s32 %s1799_s19, %s2299_s23 }
   0xa   : > { %p1181_p6 = scmp.ge.s32.totalorder %s1803_s20, 1  ;;  %p144_p7 = scmp.eq.s32.totalorder %s141_s26, 0 }
   0xb   : > { %p1887_p8 = por %p163_p5, %p162_p3  ;;  %p216_p9 = scmp.lt.s32.totalorder %s1803_s20, 3 }
   0xc   : > { %s1893_s28 = scalar_select %p144_p7, %s1791_s17, %s146_s24  }
   0xd   : > { %p217_p10 = pnand %p1181_p6, %p216_p9 }
   0xe   : > { %p260_p11 = scmp.lt.s32.totalorder (!%p217_p10), %s1795_s18, 1  ;;  %s1805_s11 = smov (!%p217_p10), 2   ;;  %v1806_v5 = vmov (!%p217_p10), 0.0|0.0   ;;  %vm1810_vm0 = vmmov (!%p217_p10), 0  }
   0xf   : > { %220 = sbr.rel (%p217_p10) target bundleno = 645 (0x285), region = 36  ;;  %1529 = vmatprep.subr.bf16.mxu1 (!%p217_p10), %v1806_v5  ;;  %1505 = vmatprep.subr.bf16.mxu0 (!%p217_p10), %v1806_v5  ;;  %s1807_s22 = smov (!%p217_p10), 127  }
  0x16   : > { %s1897_s29 = scalar_select %p260_p11, %s1795_s18, 1 }
  0x18   : > { %s1183_s30 = sshll.u32 %s1897_s29, 3  ;;  %s1192_s12 = sshll.u32 %s1897_s29, 7 }
  0x19   : > { %s266_s7 = scalar_lea.vmem %s2286_s0, %s1183_s30  ;;  %s273_s10 = scalar_lea.vmem %s2287_s1, %s1183_s30 }
  0x1a   : > { %v1906_v0 = vld [vmem:[%s266_s7] sm:$0xff]  ;;  %s1916_s21 = scalar_lea.vmem %s2288_s2, %s1192_s12  ;;  %s1187_s24 = sshll.u32 %s1897_s29, 2 }
  0x1b   : > { %v1908_v1 = vld [vmem:[%s273_s10] sm:$0xff]  ;;  %284 = vmax.xlane.f32.xlu0 %v1906_v0  ;;  %v294_v3 = vld [vmem:[%s1916_s21 + $0x8] sm:$0xff]  ;;  %v295_v4 = vld [vmem:[%s1916_s21 + $0x10] sm:$0xff]  ;;  %s282_s5 = scalar_lea.vmem %s2289_s3, %s1187_s24  ;;  %s257_s29 = sand.u32 1, %s1787_s16  }
  0x1c   : > { %1005 = vrot.lane.b32.xlu1 %v1908_v1, %s1805_s11  ;;  %v293_v2 = vld [vmem:[%s1916_s21] sm:$0xff]  ;;  %v359_v7 = vand.u32 4294901760, %v294_v3  ;;  %v296_v8 = vld [vmem:[%s1916_s21 + $0x18] sm:$0xff]  ;;  %v362_v9 = vand.u32 4294901760, %v295_v4  ;;  %v298_v11 = vld [vmem:[%s1916_s21 + $0x28] sm:$0xff]  ;;  %s1182_s6 = sshll.u32 %s257_s29, 3 }
  0x1d   : > { %v356_v6 = vand.u32 4294901760, %v293_v2  ;;  %v297_v10 = vld [vmem:[%s1916_s21 + $0x20] sm:$0xff]  ;;  %v365_v12 = vand.u32 4294901760, %v296_v8  ;;  %v371_v14 = vand.u32 4294901760, %v298_v11  ;;  %v1927_v15 = vld [vmem:[%s1916_s21 + $0x30] sm:$0xff]  ;;  %v1938_v20 = vld [vmem:[%s1916_s21 + $0x38] sm:$0xff] }
  0x1e   : > { %v368_v13 = vand.u32 4294901760, %v297_v10  ;;  %v1931_v17 = vsub.f32 %v294_v3, %v359_v7  ;;  %v1933_v18 = vsub.f32 %v295_v4, %v362_v9  ;;  %v374_v28 = vand.u32 4294901760, %v1927_v15  ;;  %v1987_v41 = vld [vmem:[%s1916_s21 + $0x40] sm:$0xff]  ;;  %v1992_v46 = vld [vmem:[%s1916_s21 + $0x48] sm:$0xff]  ;;  %s1189_s7 = sshll.u32 %s1795_s18, 7  ;;  %s259_s8 = scalar_lea.vmem [#allocation2], %s1182_s6 }
  0x1f   : > { %v1929_v16 = vsub.f32 %v293_v2, %v356_v6  ;;  %v1935_v19 = vpack.c.bf16 %v359_v7, %v356_v6  ;;  %v1940_v21 = vsub.f32 %v296_v8, %v365_v12  ;;  %v1944_v23 = vsub.f32 %v298_v11, %v371_v14  ;;  %s1067_s9 = sshll.u32 %s259_s8, 4  ;;  %s2239_s12 = scalar_lea.hbm %s2290_s4, %s1189_s7  ;;  %s2241_s9 = int_to_ptr.vmem [resolvable:$true] %s1067_s9 }
  0x20   : > { %v1942_v22 = vsub.f32 %v297_v10, %v368_v13  ;;  %v1946_v24 = vpack.c.bf16 %v365_v12, %v362_v9  ;;  %v456_v26 = vand.u32 4294901760, %v1931_v17  ;;  %v463_v27 = vand.u32 4294901760, %v1933_v18  ;;  %s1053_s13 = scalar_lea.sflag [#allocation3], %s257_s29  ;;  %s1725_s14 = scalar_lea.vmem %s2241_s9, 128 }
  0x21   : > { %v449_v25 = vand.u32 4294901760, %v1929_v16  ;;  %1507 = vmatpush3.bf16.msra.mxu0 %v1935_v19  ;;  %v470_v29 = vand.u32 4294901760, %v1940_v21  ;;  %v484_v31 = vand.u32 4294901760, %v1944_v23  ;;  %v377_v32 = vand.u32 4294901760, %v1938_v20  ;;  %p1726_p12 = scmp.ne.s32.totalorder %s2241_s9, %s1725_s14  ;;  %s1814_s18 = smov [#allocation2]  }
  0x22   : > { %v477_v30 = vand.u32 4294901760, %v1942_v22  ;;  %1508 = vmatprep.subr.bf16.mxu0 %v1806_v5  ;;  %v457_v34 = vsub.f32 %v1931_v17, %v456_v26  ;;  %v464_v35 = vsub.f32 %v1933_v18, %v463_v27  ;;  %v1970_v36 = vsub.f32 %v1927_v15, %v374_v28 }
  0x23   : > { %v450_v33 = vsub.f32 %v1929_v16, %v449_v25  ;;  %v471_v37 = vsub.f32 %v1940_v21, %v470_v29  ;;  %v485_v39 = vsub.f32 %v1944_v23, %v484_v31  ;;  %v1984_v40 = vsub.f32 %v1938_v20, %v377_v32  ;;  %p1727_p13 = pnand %p1726_p12, %p1880_p4 }
  0x24   : > { %v478_v38 = vsub.f32 %v1942_v22, %v477_v30  ;;  %v458_v43 = vand.u32 4294901760, %v457_v34  ;;  %v465_v44 = vand.u32 4294901760, %v464_v35  ;;  %v491_v45 = vand.u32 4294901760, %v1970_v36  ;;  %v303_v34 = vld [vmem:[%s1916_s21 + $0x50] sm:$0xff]  ;;  %v304_v35 = vld [vmem:[%s1916_s21 + $0x58] sm:$0xff] }
  0x25   : > { %v451_v42 = vand.u32 4294901760, %v450_v33  ;;  %1510 = vmatpush3.bf16.msra.mxu0 %v1946_v24  ;;  %v472_v47 = vand.u32 4294901760, %v471_v37  ;;  %v498_v48 = vand.u32 4294901760, %v1984_v40  ;;  %v1996_v50 = vpack.c.bf16 %v371_v14, %v368_v13  ;;  %p1728_p0 = pneg %p1727_p13 }
  0x26   : > { %1511 = vmatprep.subr.bf16.mxu0 %v1806_v5  ;;  %v380_v51 = vand.u32 4294901760, %v1987_v41  ;;  %v479_v52 = vand.u32 4294901760, %v478_v38  ;;  %v492_v53 = vsub.f32 %v1970_v36, %v491_v45  ;;  %v383_v54 = vand.u32 4294901760, %v1992_v46 }
  0x27   : > { %v1530_v49 = vpack.c.bf16 %v458_v43, %v451_v42  ;;  %v1533_v55 = vpack.c.bf16 %v472_v47, %v465_v44  ;;  %v486_v56 = vand.u32 4294901760, %v485_v39  ;;  %v499_v57 = vsub.f32 %v1984_v40, %v498_v48  ;;  %v305_v43 = vld [vmem:[%s1916_s21 + $0x60] sm:$0xff]  ;;  %v306_v44 = vld [vmem:[%s1916_s21 + $0x68] sm:$0xff] }
  0x28   : > { %v2010_v58 = vsub.f32 %v1987_v41, %v380_v51  ;;  %v2016_v59 = vsub.f32 %v1992_v46, %v383_v54  ;;  %v493_v63 = vand.u32 4294901760, %v492_v53  ;;  %v386_v37 = vand.u32 4294901760, %v303_v34 }
  0x29   : > { %1531 = vmatpush3.bf16.msra.mxu1 %v1530_v49  ;;  %1513 = vmatpush3.bf16.msra.mxu0 %v1996_v50  ;;  %v1536_v62 = vpack.c.bf16 %v486_v56, %v479_v52  ;;  %v500_v2 = vand.u32 4294901760, %v499_v57  ;;  %v389_v38 = vand.u32 4294901760, %v304_v35  ;;  %v392_v49 = vand.u32 4294901760, %v305_v43 }
  0x2a   : > { %1532 = vmatprep.subr.bf16.mxu1 %v1806_v5  ;;  %1514 = vmatprep.subr.bf16.mxu0 %v1806_v5  ;;  %v505_v60 = vand.u32 4294901760, %v2010_v58  ;;  %v512_v61 = vand.u32 4294901760, %v2016_v59  ;;  %v2041_v39 = vsub.f32 %v303_v34, %v386_v37  ;;  %v395_v52 = vand.u32 4294901760, %v306_v44 }
  0x2b   : > { %v1539_v6 = vpack.c.bf16 %v500_v2, %v493_v63  ;;  %v2043_v42 = vsub.f32 %v304_v35, %v389_v38  ;;  %v2055_v56 = vsub.f32 %v305_v43, %v392_v49  ;;  %v1812_v34 = vmov 2  }
  0x2c   : > { %v506_v3 = vsub.f32 %v2010_v58, %v505_v60  ;;  %v513_v4 = vsub.f32 %v2016_v59, %v512_v61  ;;  %v2057_v57 = vsub.f32 %v306_v44, %v395_v52  ;;  %v2094_v35 = vpack.c.bf16 %v389_v38, %v386_v37 }
  0x2d   : > { %1534 = vmatpush3.bf16.msra.mxu1 %v1533_v55  ;;  %v526_v47 = vand.u32 4294901760, %v2043_v42  ;;  %v533_v2 = vand.u32 4294901760, %v2055_v56 }
  0x2e   : > { %1535 = vmatprep.subr.bf16.mxu1 %v1806_v5  ;;  %v507_v7 = vand.u32 4294901760, %v506_v3  ;;  %v514_v8 = vand.u32 4294901760, %v513_v4  ;;  %v540_v3 = vand.u32 4294901760, %v2057_v57  ;;  %v307_v4 = vld [vmem:[%s1916_s21 + $0x70] sm:$0xff] }
  0x2f   : > { %v527_v55 = vsub.f32 %v2043_v42, %v526_v47  ;;  %v398_v20 = vand.u32 4294901760, %v307_v4 }
  0x30   : > { %v1542_v9 = vpack.c.bf16 %v514_v8, %v507_v7  ;;  %v2067_v7 = vpack.c.bf16 %v377_v32, %v374_v28  ;;  %v1808_v8 = vmov 1   ;;  %v541_v15 = vsub.f32 %v2057_v57, %v540_v3 }
  0x31   : > { %1537 = vmatpush3.bf16.msra.mxu1 %v1536_v62  ;;  %v528_v63 = vand.u32 4294901760, %v527_v55  ;;  %1714 = vset.pattern.permute.xlu1 %v1808_v8  ;;  %v2085_v46 = vsub.f32 %v307_v4, %v398_v20 }
  0x32   : > { %1538 = vmatprep.subr.bf16.mxu1 %v1806_v5  ;;  %1516 = vmatpush3.bf16.msra.mxu0 %v2067_v7  ;;  %v542_v41 = vand.u32 4294901760, %v541_v15 }
  0x33   : > { %1517 = vmatprep.subr.bf16.mxu0 %v1806_v5  ;;  %v547_v43 = vand.u32 4294901760, %v2085_v46 }
  0x35   : > { %1540 = vmatpush3.bf16.msra.mxu1 %v1539_v6  ;;  %v308_v6 = vld [vmem:[%s1916_s21 + $0x78] sm:$0xff]  ;;  %s1729_s21 = sshll.u32 %s1814_s18, 4  ;;  %s1730_s21 = int_to_ptr.vmem [resolvable:$false] %s1729_s21 }
  0x36   : > { %1541 = vmatprep.subr.bf16.mxu1 %v1806_v5  ;;  %v401_v28 = vand.u32 4294901760, %v308_v6  ;;  %p1732_p1 = scmp.lt.s32.totalorder %s2241_s9, %s1730_s21 }
  0x39   : > { %1543 = vmatpush3.bf16.msra.mxu1 %v1542_v9 }
  0x3a   : > { %1544 = vmatprep.subr.bf16.mxu1 %v1806_v5 }
  0x8e   : > { %v1006_v10 = vpop.permute.xlu1 %1005 }
  0x8f   : > { %v2032_v11 = vsub.f32 %v1908_v1, %v1006_v10  ;;  %v2073_v10 = vpack.c.bf16 %v383_v54, %v380_v51  ;;  %v2087_v51 = vsub.f32 %v308_v6, %v401_v28  ;;  %v1809_v54 = vmov 0  }
  0x90   : > { %1713 = vset.pattern.permute.xlu0 %v1809_v54  ;;  %v2116_v6 = vpack.c.bf16 %v401_v28, %v398_v20 }
  0x91   : > { %1010 = vrot.lane.b32.xlu1 %v2032_v11, %s1807_s22  ;;  %1519 = vmatpush3.bf16.msra.mxu0 %v2073_v10  ;;  %v554_v44 = vand.u32 4294901760, %v2087_v51  ;;  %s1731_s22 = scalar_lea.vmem %s1730_s21, 256 }
  0x92   : > { %1520 = vmatprep.subr.bf16.mxu0 %v1806_v5  ;;  %p1733_p2 = scmp.lt.s32.totalorder %s1731_s22, %s1725_s14 }
  0x93   : > { %v555_v37 = vsub.f32 %v2087_v51, %v554_v44 }
  0x94   : > { %p1734_p3 = por %p1733_p2, %p1732_p1 }
  0x95   : > { %323 = vperm.xlu1 %1714, %v1908_v1   ;;  %1522 = vmatpush3.bf16.msra.mxu0 %v2094_v35  ;;  %v556_v55 = vand.u32 4294901760, %v555_v37  ;;  %v1566_v37 = vpack.c.bf16 %v2016_v59, %v2010_v58 }
  0x96   : > { %1523 = vmatprep.subr.bf16.mxu0 %v1806_v5  ;;  %p1735_p5 = pnand %p1734_p3, %p1728_p0 }
  0x99   : > { %1715 = vset.pattern.permute.xlu1 %v1812_v34 }
  0x9a   : > { %334 = vperm.xlu1 %1715, %v1908_v1  }
  0xa8   : > { %v285_v12 = vpop.xlane.xlu0 %284 }
  0xa9   : > { %v286_v13 = vsub.f32 %v1906_v0, %v285_v12  ;;  %v519_v0 = vand.u32 4294901760, %v2041_v39  ;;  %v534_v12 = vsub.f32 %v2055_v56, %v533_v2 }
  0xab   : > { %v287_v14 = vmul.f32 1.442695, %v286_v13  ;;  %v520_v53 = vsub.f32 %v2041_v39, %v519_v0  ;;  %v535_v32 = vand.u32 4294901760, %v534_v12 }
  0xad   : > { %1719 = vpow2.f32 %v287_v14  ;;  %v521_v62 = vand.u32 4294901760, %v520_v53  ;;  %v1548_v13 = vpack.c.bf16 %v542_v41, %v535_v32  ;;  %v1811_v14 = vmov 0.0  }
  0xae   : > { %1362 = vmatprep.mubr.msk.f32.mxu1 %vm1810_vm0, %v1811_v14  ;;  %1327 = vmatprep.mubr.msk.f32.mxu0 %vm1810_vm0, %v1811_v14  ;;  %v548_v53 = vsub.f32 %v2085_v46, %v547_v43 }
  0xaf   : > { %v1545_v9 = vpack.c.bf16 %v528_v63, %v521_v62  ;;  %v2109_v62 = vpack.c.bf16 %v395_v52, %v392_v49  ;;  %v1813_v63 = vmov 3   ;;  %v1569_v49 = vpack.c.bf16 %v2043_v42, %v2041_v39 }
  0xb0   : > { %v549_v38 = vand.u32 4294901760, %v548_v53  ;;  %1716 = vset.pattern.permute.xlu1 %v1813_v63  ;;  %v1575_v52 = vpack.c.bf16 %v2087_v51, %v2085_v46  ;;  %v1563_v53 = vpack.c.bf16 %v1984_v40, %v1970_v36 }
  0xb1   : > { %1546 = vmatpush3.bf16.msra.mxu1 %v1545_v9  ;;  %345 = vperm.xlu1 %1716, %v1908_v1  }
  0xb2   : > { %1547 = vmatprep.subr.bf16.mxu1 %v1806_v5  ;;  %v1551_v4 = vpack.c.bf16 %v556_v55, %v549_v38  ;;  %1525 = vmatpush3.bf16.msra.mxu0 %v2109_v62  ;;  %v1602_v38 = vpack.c.bf16 %v456_v26, %v449_v25 }
  0xb3   : > { %1526 = vmatprep.subr.bf16.mxu0 %v1806_v5 }
  0xb5   : > { %1549 = vmatpush3.bf16.msra.mxu1 %v1548_v13  ;;  %1717 = vset.pattern.permute.xlu1 %v1812_v34  ;;  %v1557_v13 = vpack.c.bf16 %v1940_v21, %v1933_v18  ;;  %v1614_v18 = vpack.c.bf16 %v512_v61, %v505_v60  ;;  %v1617_v21 = vpack.c.bf16 %v526_v47, %v519_v0 }
  0xb6   : > { %1550 = vmatprep.subr.bf16.mxu1 %v1806_v5  ;;  %1528 = vmatpush3.bf16.msra.mxu0 %v2116_v6 }
  0xb7   : > { %v2036_v33 = vpop.eup %1719  ;;  %1553 = vmatprep.subr.bf16.mxu0 %v1806_v5 }
  0xb8   : > { %289 = vadd.xlane.f32.xlu0 %v2036_v33 }
  0xb9   : > { %1552 = vmatpush3.bf16.msra.mxu1 %v1551_v4 }
  0xba   : > { %1577 = vmatprep.subr.bf16.mxu1 %v1806_v5 }
  0xce   : > { %313 = vperm.xlu0 %1713, %v1908_v1   ;;  %v1572_v1 = vpack.c.bf16 %v2057_v57, %v2055_v56 }
  0xd2   : > { %1718 = vset.pattern.permute.xlu0 %v1812_v34  ;;  %v1560_v34 = vpack.c.bf16 %v1944_v23, %v1942_v22  ;;  %v1620_v22 = vpack.c.bf16 %v540_v3, %v533_v2  ;;  %v1623_v23 = vpack.c.bf16 %v554_v44, %v547_v43 }
 0x103   : > { %v1011_v8 = vpop.permute.xlu1 %1010 }
 0x104   : > { %v1013_v9 = vmul.f32 %v1011_v8, %v2032_v11 }
 0x106   : > { %1024 = vperm.xlu1 %1717, %v1013_v9  }
 0x145   : > { %v290_v12 = vpop.xlane.xlu0 %289 }
 0x146   : > { %1721 = vrcp.f32 %v290_v12 }
 0x150   : > { %v1722_v15 = vpop.eup %1721 }
 0x151   : > { %v292_v20 = vmul.f32 %v1722_v15, %v2036_v33  ;;  %v1554_v33 = vpack.c.bf16 %v1931_v17, %v1929_v16  ;;  %v1608_v16 = vpack.c.bf16 %v484_v31, %v477_v30  ;;  %v1611_v17 = vpack.c.bf16 %v498_v48, %v491_v45  ;;  %v310_v30 = vld [vmem:[%s282_s5] sm:$0xf]  ;;  %v314_v45 = vpop.permute.xlu0 %313 }
 0x152   : > { %v1015_v44 = vrot.slane %v310_v30, 6 }
 0x153   : > { %v2128_v28 = vand.u32 4294901760, %v292_v20 }
 0x154   : > { %v1017_v55 = vsub.f32 %v310_v30, %v1015_v44 }
 0x155   : > { %1363 = vmatmul.mubr.f32.vlgmr.msra.gmra.mrb[0].mxu1 %v2128_v28  ;;  %v437_v32 = vsub.f32 %v292_v20, %v2128_v28 }
 0x156   : > { %1579 = vmatpush3.bf16.msra.mxu1 %v1935_v19  ;;  %1432 = vmatprep.mubr.msk.f32.mxu1 %vm1810_vm0, %v1811_v14 }
 0x157   : > { %1580 = vmatprep.subr.bf16.mxu1 %v1806_v5  ;;  %v438_v11 = vand.u32 4294901760, %v437_v32 }
 0x159   : > { %v439_v41 = vsub.f32 %v437_v32, %v438_v11 }
 0x15a   : > { %1582 = vmatpush3.bf16.msra.mxu1 %v1946_v24 }
 0x15b   : > { %1583 = vmatprep.subr.bf16.mxu1 %v1806_v5  ;;  %v440_v54 = vand.u32 4294901760, %v439_v41 }
 0x15d   : > { %1328 = vmatmul.mubr.f32.vlgmr.msra.gmra.mrb[0].mxu0 %v440_v54 }
 0x15e   : > { %1555 = vmatpush3.bf16.msra.mxu0 %v1554_v33  ;;  %1585 = vmatpush3.bf16.msra.mxu1 %v1996_v50 }
 0x15f   : > { %1556 = vmatprep.subr.bf16.mxu0 %v1806_v5  ;;  %1586 = vmatprep.subr.bf16.mxu1 %v1806_v5 }
 0x160   : > { %1397 = vmatprep.mubr.msk.f32.mxu0 %vm1810_vm0, %v1811_v14 }
 0x162   : > { %1558 = vmatpush3.bf16.msra.mxu0 %v1557_v13  ;;  %1588 = vmatpush3.bf16.msra.mxu1 %v2067_v7 }
 0x163   : > { %1559 = vmatprep.subr.bf16.mxu0 %v1806_v5  ;;  %1589 = vmatprep.subr.bf16.mxu1 %v1806_v5 }
 0x166   : > { %1561 = vmatpush3.bf16.msra.mxu0 %v1560_v34  ;;  %1591 = vmatpush3.bf16.msra.mxu1 %v2073_v10 }
 0x167   : > { %1562 = vmatprep.subr.bf16.mxu0 %v1806_v5  ;;  %1592 = vmatprep.subr.bf16.mxu1 %v1806_v5 }
 0x16a   : > { %1564 = vmatpush3.bf16.msra.mxu0 %v1563_v53  ;;  %1594 = vmatpush3.bf16.msra.mxu1 %v2094_v35 }
 0x16b   : > { %1565 = vmatprep.subr.bf16.mxu0 %v1806_v5  ;;  %1595 = vmatprep.subr.bf16.mxu1 %v1806_v5 }
 0x16e   : > { %1567 = vmatpush3.bf16.msra.mxu0 %v1566_v37  ;;  %1597 = vmatpush3.bf16.msra.mxu1 %v2109_v62 }
 0x16f   : > { %1568 = vmatprep.subr.bf16.mxu0 %v1806_v5  ;;  %1598 = vmatprep.subr.bf16.mxu1 %v1806_v5 }
 0x172   : > { %1570 = vmatpush3.bf16.msra.mxu0 %v1569_v49  ;;  %1600 = vmatpush3.bf16.msra.mxu1 %v2116_v6 }
 0x173   : > { %1571 = vmatprep.subr.bf16.mxu0 %v1806_v5  ;;  %1625 = vmatprep.subr.bf16.mxu1 %v1806_v5 }
 0x175   : > { %1433 = vmatmul.mubr.f32.vlgmr.msra.gmra.mrb[2].mxu1 %v438_v11 }
 0x176   : > { %1573 = vmatpush3.bf16.msra.mxu0 %v1572_v1  ;;  %1627 = vmatpush3.bf16.msra.mxu1 %v1935_v19  ;;  %v1605_v19 = vpack.c.bf16 %v470_v29, %v463_v27  ;;  %v324_v29 = vpop.permute.xlu1 %323 }
 0x177   : > { %1574 = vmatprep.subr.bf16.mxu0 %v1806_v5  ;;  %1628 = vmatprep.subr.bf16.mxu1 %v1806_v5 }
 0x178   : > { %1502 = vmatprep.mubr.msk.f32.mxu1 %vm1810_vm0, %v1811_v14 }
 0x17a   : > { %1576 = vmatpush3.bf16.msra.mxu0 %v1575_v52  ;;  %1630 = vmatpush3.bf16.msra.mxu1 %v1946_v24  ;;  %v316_v24 = vlaneseq }
 0x17b   : > { %1601 = vmatprep.subr.bf16.mxu0 %v1806_v5  ;;  %1631 = vmatprep.subr.bf16.mxu1 %v1806_v5 }
 0x17c   : > { %v317_v25 = vshrl.u32 %v316_v24, 7 }
 0x17d   : > { %1398 = vmatmul.mubr.f32.vlgmr.msra.gmra.mrb[2].mxu0 %v437_v32 }
 0x17e   : > { %1603 = vmatpush3.bf16.msra.mxu0 %v1602_v38  ;;  %1633 = vmatpush3.bf16.msra.mxu1 %v1996_v50  ;;  %v328_v26 = vsub.s32 1, %v317_v25  ;;  %v318_v27 = vsub.s32 0, %v317_v25  ;;  %v339_v36 = vsub.s32 2, %v317_v25  ;;  %v335_v50 = vpop.permute.xlu1 %334  ;;  %v350_v59 = vsub.s32 3, %v317_v25 }
 0x17f   : > { %1604 = vmatprep.subr.bf16.mxu0 %v1806_v5  ;;  %1634 = vmatprep.subr.bf16.mxu1 %v1806_v5 }
 0x180   : > { %1467 = vmatprep.mubr.msk.f32.mxu0 %vm1810_vm0, %v1811_v14  ;;  %v329_v31 = vrot.slane %v310_v30, %v328_v26  ;;  %v319_v40 = vrot.slane %v310_v30, %v318_v27  ;;  %v340_v58 = vrot.slane %v310_v30, %v339_v36  ;;  %v351_v42 = vrot.slane %v310_v30, %v350_v59 }
 0x182   : > { %1606 = vmatpush3.bf16.msra.mxu0 %v1605_v19  ;;  %1636 = vmatpush3.bf16.msra.mxu1 %v2067_v7  ;;  %v330_v48 = vsub.f32 %v324_v29, %v329_v31  ;;  %v341_v61 = vsub.f32 %v335_v50, %v340_v58  ;;  %v346_v0 = vpop.permute.xlu1 %345  ;;  %v1001_v63 = vmax.f32 %v324_v29, %v329_v31 }
 0x183   : > { %1607 = vmatprep.subr.bf16.mxu0 %v1806_v5  ;;  %1637 = vmatprep.subr.bf16.mxu1 %v1806_v5  ;;  %v352_v56 = vsub.f32 %v346_v0, %v351_v42  ;;  %v996_v4 = vmin.f32 %v335_v50, %v340_v58  ;;  %v997_v49 = vmax.f32 %v314_v45, %v319_v40 }
 0x184   : > { %v331_v60 = vand.u32 2147483647, %v330_v48  ;;  %v342_v47 = vand.u32 2147483647, %v341_v61  ;;  %v1037_v12 = vmin.f32 %v324_v29, %v329_v31  ;;  %v1033_v15 = vmax.f32 %v335_v50, %v340_v58 }
 0x185   : > { %v353_v3 = vand.u32 2147483647, %v352_v56  ;;  %v998_v8 = vsub.f32 %v996_v4, %v997_v49  ;;  %v1036_v11 = vmax.f32 %v346_v0, %v351_v42  ;;  %v1034_v33 = vmin.f32 %v314_v45, %v319_v40 }
 0x186   : > { %1609 = vmatpush3.bf16.msra.mxu0 %v1608_v16  ;;  %1639 = vmatpush3.bf16.msra.mxu1 %v2073_v10  ;;  %v1025_v54 = vpop.permute.xlu1 %1024 }
 0x187   : > { %1610 = vmatprep.subr.bf16.mxu0 %v1806_v5  ;;  %1640 = vmatprep.subr.bf16.mxu1 %v1806_v5  ;;  %v999_v41 = vmax.f32 %v998_v8, 0.0  ;;  %v1038_v13 = vsub.f32 %v1036_v11, %v1037_v12  ;;  %v1035_v34 = vsub.f32 %v1033_v15, %v1034_v33 }
 0x18a   : > { %1612 = vmatpush3.bf16.msra.mxu0 %v1611_v17  ;;  %1642 = vmatpush3.bf16.msra.mxu1 %v2094_v35  ;;  %v1039_v17 = vmul.f32 %v1038_v13, %v1035_v34 }
 0x18b   : > { %1613 = vmatprep.subr.bf16.mxu0 %v1806_v5  ;;  %1643 = vmatprep.subr.bf16.mxu1 %v1806_v5 }
 0x18e   : > { %1615 = vmatpush3.bf16.msra.mxu0 %v1614_v18  ;;  %1645 = vmatpush3.bf16.msra.mxu1 %v2109_v62  ;;  %v1019_v62 = vrot.slane %v1017_v55, 1 }
 0x18f   : > { %1616 = vmatprep.subr.bf16.mxu0 %v1806_v5  ;;  %1646 = vmatprep.subr.bf16.mxu1 %v1806_v5 }
 0x190   : > { %v1021_v1 = vmul.f32 %v1019_v62, %v1017_v55 }
 0x192   : > { %1618 = vmatpush3.bf16.msra.mxu0 %v1617_v21  ;;  %1648 = vmatpush3.bf16.msra.mxu1 %v2116_v6  ;;  %v1000_v6 = vmin.f32 %v346_v0, %v351_v42  ;;  %v1030_v20 = vrot.slane %v1021_v1, %v339_v36 }
 0x193   : > { %1619 = vmatprep.subr.bf16.mxu0 %v1806_v5 }
 0x194   : > { %v1002_v52 = vsub.f32 %v1000_v6, %v1001_v63  ;;  %v1031_v37 = vadd.f32 %v1030_v20, %v1025_v54 }
 0x195   : > { %1503 = vmatmul.mubr.f32.vlgmr.msra.gmra.mrb[4].mxu1 %v2128_v28 }
 0x196   : > { %1621 = vmatpush3.bf16.msra.mxu0 %v1620_v22  ;;  %v1003_v32 = vmax.f32 %v1002_v52, 0.0 }
 0x197   : > { %1622 = vmatprep.subr.bf16.mxu0 %v1806_v5  ;;  %v320_v5 = vsub.f32 %v314_v45, %v319_v40 }
 0x198   : > { %v1004_v53 = vmul.f32 %v1003_v32, %v999_v41 }
 0x199   : > { %v321_v39 = vand.u32 2147483647, %v320_v5 }
 0x19a   : > { %1624 = vmatpush3.bf16.msra.mxu0 %v1623_v23  ;;  %v1032_v18 = vsub.f32 %v1031_v37, %v1004_v53  ;;  %v1042_v30 = vmul.f32 %v1039_v17, %v1004_v53 }
 0x19b   : > { %v332_v57 = vadd.f32 %v331_v60, %v321_v39 }
 0x19c   : > { %v1044_v22 = vmul.f32 %v1039_v17, %v1032_v18  ;;  %v1040_v24 = vsub.f32 %v1039_v17, %v1032_v18 }
 0x19d   : > { %1468 = vmatmul.mubr.f32.vlgmr.msra.gmra.mrb[4].mxu0 %v2128_v28  ;;  %v343_v10 = vadd.f32 %v342_v47, %v332_v57 }
 0x19e   : > { %1723 = vrcp.f32 %v1044_v22  ;;  %v1041_v29 = vmul.f32 %v1040_v24, %v1032_v18 }
 0x19f   : > { %v354_v46 = vadd.f32 %v353_v3, %v343_v10 }
 0x1a0   : > { %v1043_v36 = vsub.f32 %v1041_v29, %v1042_v30 }
 0x1a8   : > { %v1724_v23 = vpop.eup %1723 }
 0x1a9   : > { %v1046_v25 = vmul.f32 %v1724_v23, %v1044_v22 }
 0x1ab   : > { %v1047_v31 = vsub.f32 2.0, %v1046_v25 }
 0x1ad   : > { %v1048_v40 = vmul.f32 %v1724_v23, %v1047_v31 }
 0x1af   : > { %v1049_v58 = vmul.f32 %v1048_v40, %v1043_v36 }
 0x228   : > { %v593_v2 = vpop.f32.mrb[0].mxu1 }
 0x229   : > { %v1364_v7 = vpop.f32.mrb[1].mxu1 }
 0x230   : > { %v442_v51 = vpop.f32.mrb[0].mxu0 }
 0x231   : > { %v443_v14 = vadd.f32 %v442_v51, %v354_v46  ;;  %v1329_v35 = vpop.f32.mrb[1].mxu0 }
 0x233   : > { %v594_v43 = vadd.f32 %v593_v2, %v443_v14 }
 0x248   : > { %v786_v9 = vpop.f32.mrb[2].mxu1 }
 0x249   : > { %v1434_v28 = vpop.f32.mrb[3].mxu1 }
 0x250   : > { %v697_v38 = vpop.f32.mrb[2].mxu0 }
 0x251   : > { %v698_v19 = vadd.f32 %v697_v38, %v594_v43  ;;  %v1399_v16 = vpop.f32.mrb[3].mxu0 }
 0x253   : > { %v787_v21 = vadd.f32 %v786_v9, %v698_v19 }
 0x268   : > { %v992_v26 = vpop.f32.mrb[4].mxu1 }
 0x269   : > { %v1504_v27 = vpop.f32.mrb[5].mxu1 }
 0x270   : > { %v905_v45 = vpop.f32.mrb[4].mxu0 }
 0x271   : > { %v906_v48 = vadd.f32 %v905_v45, %v787_v21  ;;  %v1469_v5 = vpop.f32.mrb[5].mxu0 }
 0x273   : > { %v993_v50 = vadd.f32 %v992_v26, %v906_v48 }
 0x275   : > { %v1050_v59 = vadd.f32 %v1049_v58, %v993_v50 }
 0x277   : > { %1051 = vst [vmem:[%s259_s8] sm:$0xff] %v1050_v59 }
 0x278   : > { %1738 = shalt.err (!%p1735_p5)
}
 0x279   : > { %s1739_s24 = scalar_lea.hbm %s2239_s12, 128  ;;  %s1743_s5 = scalar_lea.hbm %s2290_s4, 256 }
 0x27a   : > { %p1740_p6 = scmp.ne.s32.totalorder %s2239_s12, %s1739_s24  ;;  %p1744_p10 = scmp.lt.u32.totalorder %s2239_s12, %s2290_s4 }
 0x27b   : > { %p1745_p11 = scmp.lt.u32.totalorder %s1743_s5, %s1739_s24  ;;  %p1747_p13 = scmp.lt.u32.totalorder %s1739_s24, %s2239_s12 }
 0x27c   : > { %p1741_p7 = pnand %p1740_p6, %p1880_p4 }
 0x27d   : > { %p1746_p12 = por %p1745_p11, %p1744_p10 }
 0x27e   : > { %p1742_p9 = pneg %p1741_p7 }
 0x27f   : > { %p1748_p0 = por %p1747_p13, %p1746_p12 }
 0x281   : > { %p1749_p1 = pnand %p1748_p0, %p1742_p9 }
 0x283   : > { %1752 = shalt.err (!%p1749_p1)
}
 0x284   : > { %1649 = dma.vmem_to_hbm [thread:$0]  (%p1880_p4), %s2241_s9, 128, %s2239_s12, %s1053_s13  }
 0x285 PF: > { %p1655_p2 = scmp.ge.s32.totalorder %s1803_s20, 2  ;;  %s1079_s7 = sand.u32 1, %s1783_s15  }
 0x286   : > { %s1080_s8 = scalar_lea.sflag [#allocation3], %s1079_s7 }
 0x287   : > { %p1652_p3 = pnand %p1655_p2, %p1887_p8 }
 0x289   : > { %1778 = dma.done.wait (!%p1652_p3), %s1080_s8, 128  }
 0x28a   : > { %1780 = vsyncadd (!%p1652_p3), %s1080_s8, 4294967168  ;;  %s17_s20 = sadd.s32 1, %s1803_s20   ;;  %s2293_s15 = smov %s1787_s16 }
 0x28b   : > { %p14_p5 = scmp.ge.s32.totalorder %s17_s20, 4   ;;  %s2294_s16 = smov %s1791_s17 }
 0x28c   : > { %s2295_s17 = smov %s1893_s28  ;;  %s2296_s18 = smov %s1799_s19 }
 0x28d   : > { %s2297_s19 = smov %s2299_s23  ;;  %16 = sbr.rel (!%p14_p5) target bundleno = 4 (0x4), region = 80 }
 0x294   :  { %1085 = vsyncpa [#allocation3], 1 }
 0x295   :  { %1087 = vsyncpa [#allocation3 + $0x1], 1 }

</bundles_post_ra>
